<compile_context>
chip_gen: v7x
topology: tpu7x:2x2x1
jax: 0.10.0
libtpu: 0.0.40
codegen_flags: <defaults>
</compile_context>

<pallas_src>
import functools

import jax
import jax.numpy as jnp
from jax import lax
from jax.experimental import pallas as pl
from jax.experimental.pallas import tpu as pltpu

CHANNELS = (4, 16, 8)   # channels[0]=data ch, channels[1]=hidden, channels[-1]=2*latent
KERNEL = 5
EPS = 1e-5              # BatchNorm1d default eps
NEG_SLOPE = 0.01        # LeakyReLU default negative_slope

C0 = CHANNELS[0]                 # 4  data channels
C1 = CHANNELS[1]                 # 16 hidden channels
C2 = CHANNELS[2]                 # 8  = 2 * latent channels
CZ = C2 // 2                     # 4  latent channels
CPAD = 8                         # Cin=4 convs padded to a full 8-sublane group
W_NARROW = KERNEL * CPAD + 1     # 41: flattened (k, cin) weight + bias column
W_WIDE = KERNEL * C1 + 1         # 81: flattened (k, cin) weight + bias column


def _topvae_kernel(in_ref, w_ref, out_ref, *, time_len):
    L = in_ref.shape[-1]          # B*T lanes
    T = time_len                  # per-batch time length
    K = KERNEL
    P = K // 2
    f32 = jnp.float32

    # Per-tap validity masks for 'same' padding; lanes are ordered
    # (batch, time) so the per-batch position is lane % T.  Hoisted once,
    # shared by all four convs.
    pos = lax.broadcasted_iota(jnp.int32, (1, L), 1) % T
    masks = []
    for k in range(K):
        d = k - P
        if d < 0:
            masks.append((pos >= -d).astype(f32))
        elif d > 0:
            masks.append((pos < T - d).astype(f32))
        else:
            masks.append(None)
    ones_row = jnp.ones((1, L), f32)                            # bias row
    top_half = lax.broadcasted_iota(jnp.int32, (8, L), 0) < 4   # sublanes 0..3

    def im2col(h):
        # h: (C, L) with C a multiple of 8 -> (K*C + 1, L).  Row r = k*C + cin
        # holds h[cin, t + k - P] (zero outside the per-batch window); every
        # part is a full 8-sublane chunk, so the concat is a layout no-op.
        # The trailing ones row folds the bias into the matmul.
        parts = []
        for k in range(K):
            d = k - P
            sh = h if d == 0 else pltpu.roll(h, shift=(-d) % L, axis=1)
            if masks[k] is not None:
                sh = sh * masks[k]
            parts.append(sh)
        parts.append(ones_row)
        return jnp.concatenate(parts, axis=0)

    def lrelu_bn(h):
        # LeakyReLU then BatchNorm1d in training mode (batch stats over all
        # B*T lanes, gamma=1 / beta=0 at fresh init).  Single-pass statistics:
        # the two reductions are independent, var clamped at 0 against
        # cancellation.
        h = jnp.where(h >= 0, h, NEG_SLOPE * h)
        inv_n = 1.0 / L
        mean = h.sum(axis=1, keepdims=True) * inv_n
        msq = (h * h).sum(axis=1, keepdims=True) * inv_n
        var = jnp.maximum(msq - mean * mean, 0.0)
        return (h - mean) * lax.rsqrt(var + EPS)

    def reparam(mlv, noise8):
        # mlv: (8, L) with rows 0:3 = mean, rows 4:7 = logvar.  noise8 rows
        # 4:7 are zero (host-padded), so the result is (8, L) with rows 0:3 =
        # noise*exp(logvar)+mean and rows 4:7 = 0 -- already in the
        # 8-sublane-padded layout the next conv's im2col expects.  One sublane
        # roll + one select; no half-vreg slices.
        lv = pltpu.roll(mlv, shift=4, axis=0)        # rows 0:3 = logvar
        mean = jnp.where(top_half, mlv, 0.0)         # rows 0:3 = mean, rest 0
        return noise8 * jnp.exp(lv) + mean

    x8 = in_ref[0:8, :]          # encoder input, channels zero-padded 4 -> 8
    nz8 = in_ref[8:16, :]        # latent noise, rows 4:7 zero
    ny8 = in_ref[16:24, :]       # output noise, rows 4:7 zero

    # ---------------- encoder ----------------
    h = lrelu_bn(jnp.dot(w_ref[0:16, 0:W_NARROW], im2col(x8),
                         preferred_element_type=f32))
    e = jnp.dot(w_ref[32:40, :], im2col(h), preferred_element_type=f32)
    z8 = reparam(e, nz8)                             # z (rows 0:3), rows 4:7 = 0

    # ---------------- decoder ----------------
    h = lrelu_bn(jnp.dot(w_ref[16:32, 0:W_NARROW], im2col(z8),
                         preferred_element_type=f32))
    r = jnp.dot(w_ref[40:48, :], im2col(h), preferred_element_type=f32)
    d = jnp.where(top_half, jax.nn.sigmoid(r), jnp.clip(r, -10.0, 0.0))
    y8 = reparam(d, ny8)                             # y (rows 0:3), rows 4:7 = 0

    # Single lane-dense output slab:
    #   rows 0:4 y | 4:8 zero | 8:12 mean_y | 12:16 logvar_y | 16:20 mean_z | 20:24 logvar_z
    out_ref[0:8, :] = y8
    out_ref[8:16, :] = d
    out_ref[16:24, :] = e


# ------------------------ host-side packing / wrapper ------------------------
def _fold(a, L):
    # (B, C, T) -> (C, B*T), lanes ordered (batch, time)
    return jnp.transpose(a, (1, 0, 2)).reshape(a.shape[1], L)


def _pad_rows(a, rows):
    return jnp.pad(a, ((0, rows - a.shape[0]), (0, 0)))


def _flat_wb(w, b, cin_pad, width):
    # Conv1d weight (Cout, Cin, K) + bias -> (Cout, width) row:
    # [k-major / cin-minor flattened weight (Cin zero-padded) | bias | zeros]
    cout, cin, k = w.shape
    wp = jnp.pad(w, ((0, 0), (0, cin_pad - cin), (0, 0)))
    wf = jnp.transpose(wp, (0, 2, 1)).reshape(cout, k * cin_pad)
    wb = jnp.concatenate([wf, b.reshape(cout, 1)], axis=1)
    return jnp.pad(wb, ((0, 0), (0, width - wb.shape[1])))


def topvae_forward(x, noise_z, noise_y, params):
    B, _, T = x.shape
    L = B * T
    f32 = jnp.float32
    vmem = pl.BlockSpec(memory_space=pltpu.MemorySpace.VMEM)

    # One input slab (24, L): rows 0:8 x (padded to 8 ch), 8:16 noise_z, 16:24 noise_y.
    in_slab = jnp.concatenate(
        [_pad_rows(_fold(x, L), 8),
         _pad_rows(_fold(noise_z, L), 8),
         _pad_rows(_fold(noise_y, L), 8)], axis=0).astype(f32)

    # One parameter slab (48, 81):
    #   rows  0:16 -> encoder conv1 (Cin 4->8 padded, 41 cols used)
    #   rows 16:32 -> decoder conv1 (Cin 4->8 padded, 41 cols used)
    #   rows 32:40 -> encoder conv2 (mean+logvar heads fused, 81 cols)
    #   rows 40:48 -> decoder conv2 (mean+logvar heads fused, 81 cols)
    w_slab = jnp.concatenate(
        [_flat_wb(params["we1"], params["be1"], CPAD, W_WIDE),
         _flat_wb(params["wd1"], params["bd1"], CPAD, W_WIDE),
         _flat_wb(params["we2"], params["be2"], C1, W_WIDE),
         _flat_wb(params["wd2"], params["bd2"], C1, W_WIDE)], axis=0).astype(f32)

    out = pl.pallas_call(
        functools.partial(_topvae_kernel, time_len=T),
        out_shape=jax.ShapeDtypeStruct((24, L), f32),
        in_specs=[vmem, vmem],
        out_specs=vmem,
    )(in_slab, w_slab)

    def unfold(a):   # (C, B*T) -> (B, C, T)
        return jnp.transpose(a.reshape(a.shape[0], B, T), (1, 0, 2))

    y = unfold(out[0:C0])
    my = unfold(out[8:8 + C0])
    lvy = unfold(out[12:12 + C0])
    mz = unfold(out[16:16 + CZ])
    lvz = unfold(out[20:20 + CZ])
    return y, my, lvy, mz, lvz


# ------------------------ parameter construction ------------------------
def make_params(key):
    def xavier(key, cout, cin, k):
        # xavier_normal_ for Conv1d weight (Cout, Cin, K)
        std = (2.0 / ((cin + cout) * k)) ** 0.5
        return jax.random.normal(key, (cout, cin, k), jnp.float32) * std

    ks = jax.random.split(key, 8)
    return {
        # encoder: Conv1d(4->16), Conv1d(16->8)
        "we1": xavier(ks[0], C1, C0, KERNEL),
        "be1": (jax.random.normal(ks[1], (C1,), jnp.float32) * 0.1).reshape(C1, 1),
        "we2": xavier(ks[2], C2, C1, KERNEL),
        "be2": (jax.random.normal(ks[3], (C2,), jnp.float32) * 0.1).reshape(C2, 1),
        # decoder (channels [8,16,4]): Conv1d(4->16), Conv1d(16->8)
        "wd1": xavier(ks[4], C1, CZ, KERNEL),
        "bd1": (jax.random.normal(ks[5], (C1,), jnp.float32) * 0.1).reshape(C1, 1),
        "wd2": xavier(ks[6], 2 * C0, C1, KERNEL),
        "bd2": (jax.random.normal(ks[7], (2 * C0,), jnp.float32) * 0.1).reshape(2 * C0, 1),
    }


# ------------------------ pure-JAX reference ------------------------
def ref_forward(x, noise_z, noise_y, params):
    P = KERNEL // 2

    def conv(h, w, b):
        out = lax.conv_general_dilated(h, w, window_strides=(1,), padding=[(P, P)],
                                       dimension_numbers=("NCH", "OIH", "NCH"))
        return out + b.reshape(1, -1, 1)

    def bn(h):
        m = h.mean(axis=(0, 2), keepdims=True)
        v = ((h - m) ** 2).mean(axis=(0, 2), keepdims=True)
        return (h - m) / jnp.sqrt(v + EPS)

    def lrelu(h):
        return jnp.where(h >= 0, h, NEG_SLOPE * h)

    h = bn(lrelu(conv(x, params["we1"], params["be1"])))
    e = conv(h, params["we2"], params["be2"])
    mz, lvz = e[:, :CZ], e[:, CZ:]
    z = noise_z * jnp.exp(lvz) + mz
    h = bn(lrelu(conv(z, params["wd1"], params["bd1"])))
    r = conv(h, params["wd2"], params["bd2"])
    my = jax.nn.sigmoid(r[:, :C0])
    lvy = jnp.clip(r[:, C0:], -10.0, 0.0)
    y = noise_y * jnp.exp(lvy) + my
    return y, my, lvy, mz, lvz


if __name__ == "__main__":
    B, T = 2, 128

    key = jax.random.PRNGKey(0)
    k_param, k_x, k_nz, k_ny = jax.random.split(key, 4)

    params = make_params(k_param)
    x = jax.random.normal(k_x, (B, C0, T), jnp.float32)
    # TODO(synk): torch.randn_like draws noise inside the module; here the Gaussian
    # noise is generated deterministically on the host and consumed in-kernel.
    noise_z = jax.random.normal(k_nz, (B, CZ, T), jnp.float32)
    noise_y = jax.random.normal(k_ny, (B, C0, T), jnp.float32)

    fwd = jax.jit(topvae_forward)
    outs = fwd(x, noise_z, noise_y, params)
    outs = jax.block_until_ready(outs)

    refs = ref_forward(x, noise_z, noise_y, params)
    names = ("y", "mean_y", "logvar_y", "mean_z", "logvar_z")
    for name, a, b in zip(names, outs, refs):
        err = float(jnp.max(jnp.abs(a - b)))
        if err > 1e-3:
            raise AssertionError(f"{name} mismatch: max abs err {err}")

    print("KERNEL_OK")
</pallas_src>

<mosaic_0001>
module attributes {stable_mosaic.version = 11 : i64} {
  func.func @_topvae_kernel(%arg0: memref<24x256xf32, #tpu.memory_space<vmem>>, %arg1: memref<48x81xf32, #tpu.memory_space<vmem>>, %arg2: memref<24x256xf32, #tpu.memory_space<vmem>>) attributes {dimension_semantics = [], scalar_prefetch = 0 : i64, scratch_operands = 0 : i64, tpu.core_type = #tpu.core_type<tc>} {
    %0 = tpu.iota {dimensions = array<i32: 1>} : vector<1x256xi32>
    %c128_i32 = arith.constant 128 : i32
    %c0_i32 = arith.constant 0 : i32
    %1 = arith.cmpi eq, %c128_i32, %c0_i32 : i32
    %c1_i32 = arith.constant 1 : i32
    %2 = arith.select %1, %c1_i32, %c128_i32 : i32
    %3 = vector.broadcast %2 : i32 to vector<1x256xi32>
    %4 = arith.remsi %0, %3 : vector<1x256xi32>
    %c0_i32_0 = arith.constant 0 : i32
    %5 = vector.broadcast %c0_i32_0 : i32 to vector<1x256xi32>
    %6 = arith.cmpi ne, %4, %5 : vector<1x256xi32>
    %c0_i32_1 = arith.constant 0 : i32
    %7 = vector.broadcast %c0_i32_1 : i32 to vector<1x256xi32>
    %8 = arith.cmpi slt, %4, %7 : vector<1x256xi32>
    %c0_i32_2 = arith.constant 0 : i32
    %9 = arith.cmpi slt, %2, %c0_i32_2 : i32
    %10 = vector.broadcast %9 : i1 to vector<1x256xi1>
    %11 = vector.broadcast %10 : vector<1x256xi1> to vector<1x256xi1>
    %12 = arith.xori %8, %11 : vector<1x256xi1>
    %13 = arith.andi %12, %6 : vector<1x256xi1>
    %14 = vector.broadcast %2 : i32 to vector<1x256xi32>
    %15 = arith.addi %4, %14 : vector<1x256xi32>
    %16 = arith.select %13, %15, %4 : vector<1x256xi1>, vector<1x256xi32>
    %c2_i32 = arith.constant 2 : i32
    %17 = vector.broadcast %c2_i32 : i32 to vector<1x256xi32>
    %18 = arith.cmpi sge, %16, %17 : vector<1x256xi32>
    %19 = arith.extui %18 : vector<1x256xi1> to vector<1x256xi32>
    %20 = arith.sitofp %19 : vector<1x256xi32> to vector<1x256xf32>
    %c1_i32_3 = arith.constant 1 : i32
    %21 = vector.broadcast %c1_i32_3 : i32 to vector<1x256xi32>
    %22 = arith.cmpi sge, %16, %21 : vector<1x256xi32>
    %23 = arith.extui %22 : vector<1x256xi1> to vector<1x256xi32>
    %24 = arith.sitofp %23 : vector<1x256xi32> to vector<1x256xf32>
    %c127_i32 = arith.constant 127 : i32
    %25 = vector.broadcast %c127_i32 : i32 to vector<1x256xi32>
    %26 = arith.cmpi slt, %16, %25 : vector<1x256xi32>
    %27 = arith.extui %26 : vector<1x256xi1> to vector<1x256xi32>
    %28 = arith.sitofp %27 : vector<1x256xi32> to vector<1x256xf32>
    %c126_i32 = arith.constant 126 : i32
    %29 = vector.broadcast %c126_i32 : i32 to vector<1x256xi32>
    %30 = arith.cmpi slt, %16, %29 : vector<1x256xi32>
    %31 = arith.extui %30 : vector<1x256xi1> to vector<1x256xi32>
    %32 = arith.sitofp %31 : vector<1x256xi32> to vector<1x256xf32>
    %cst = arith.constant 1.000000e+00 : f32
    %33 = vector.broadcast %cst : f32 to vector<1x256xf32>
    %34 = tpu.iota {dimensions = array<i32: 0>} : vector<8x256xi32>
    %c4_i32 = arith.constant 4 : i32
    %35 = vector.broadcast %c4_i32 : i32 to vector<8x256xi32>
    %36 = arith.cmpi slt, %34, %35 : vector<8x256xi32>
    %c0 = arith.constant 0 : index
    %c0_4 = arith.constant 0 : index
    %37 = vector.load %arg0[%c0, %c0_4] : memref<24x256xf32, #tpu.memory_space<vmem>>, vector<8x256xf32>
    %c8 = arith.constant 8 : index
    %c0_5 = arith.constant 0 : index
    %38 = vector.load %arg0[%c8, %c0_5] : memref<24x256xf32, #tpu.memory_space<vmem>>, vector<8x256xf32>
    %c16 = arith.constant 16 : index
    %c0_6 = arith.constant 0 : index
    %39 = vector.load %arg0[%c16, %c0_6] : memref<24x256xf32, #tpu.memory_space<vmem>>, vector<8x256xf32>
    %c0_7 = arith.constant 0 : index
    %c0_8 = arith.constant 0 : index
    %40 = vector.load %arg1[%c0_7, %c0_8] : memref<48x81xf32, #tpu.memory_space<vmem>>, vector<16x41xf32>
    %c2_i32_9 = arith.constant 2 : i32
    %41 = tpu.dynamic_rotate %37 by %c2_i32_9 dim 1 : vector<8x256xf32>, i32 -> vector<8x256xf32>
    %42 = vector.broadcast %20 : vector<1x256xf32> to vector<8x256xf32>
    %43 = arith.mulf %41, %42 : vector<8x256xf32>
    %c1_i32_10 = arith.constant 1 : i32
    %44 = tpu.dynamic_rotate %37 by %c1_i32_10 dim 1 : vector<8x256xf32>, i32 -> vector<8x256xf32>
    %45 = vector.broadcast %24 : vector<1x256xf32> to vector<8x256xf32>
    %46 = arith.mulf %44, %45 : vector<8x256xf32>
    %c255_i32 = arith.constant 255 : i32
    %47 = tpu.dynamic_rotate %37 by %c255_i32 dim 1 : vector<8x256xf32>, i32 -> vector<8x256xf32>
    %48 = vector.broadcast %28 : vector<1x256xf32> to vector<8x256xf32>
    %49 = arith.mulf %47, %48 : vector<8x256xf32>
    %c254_i32 = arith.constant 254 : i32
    %50 = tpu.dynamic_rotate %37 by %c254_i32 dim 1 : vector<8x256xf32>, i32 -> vector<8x256xf32>
    %51 = vector.broadcast %32 : vector<1x256xf32> to vector<8x256xf32>
    %52 = arith.mulf %50, %51 : vector<8x256xf32>
    %53 = tpu.concatenate %43, %46, %37, %49, %52, %33 in 0 : vector<8x256xf32>, vector<8x256xf32>, vector<8x256xf32>, vector<8x256xf32>, vector<8x256xf32>, vector<1x256xf32> -> vector<41x256xf32>
    %cst_11 = arith.constant dense<0.000000e+00> : vector<16x256xf32>
    %54 = tpu.matmul %40, %53, %cst_11 {dimension_numbers = #tpu.dot_dimension_numbers<[1], [0], [0], [1], [0, 0, 1, 1], [], []>} : vector<16x41xf32>, vector<41x256xf32>, vector<16x256xf32> -> vector<16x256xf32>
    %cst_12 = arith.constant 0.000000e+00 : f32
    %55 = vector.broadcast %cst_12 : f32 to vector<16x256xf32>
    %56 = arith.cmpf oge, %54, %55 : vector<16x256xf32>
    %cst_13 = arith.constant 0.00999999977 : f32
    %57 = vector.broadcast %cst_13 : f32 to vector<16x256xf32>
    %58 = arith.mulf %57, %54 : vector<16x256xf32>
    %59 = arith.select %56, %54, %58 : vector<16x256xi1>, vector<16x256xf32>
    %cst_14 = arith.constant dense<0.000000e+00> : vector<16xf32>
    %60 = vector.multi_reduction <add>, %59, %cst_14 [1] : vector<16x256xf32> to vector<16xf32>
    %61 = vector.shape_cast %60 : vector<16xf32> to vector<16x1xf32>
    %cst_15 = arith.constant 3.906250e-03 : f32
    %62 = vector.broadcast %cst_15 : f32 to vector<16x1xf32>
    %63 = arith.mulf %61, %62 : vector<16x1xf32>
    %64 = arith.mulf %59, %59 : vector<16x256xf32>
    %cst_16 = arith.constant dense<0.000000e+00> : vector<16xf32>
    %65 = vector.multi_reduction <add>, %64, %cst_16 [1] : vector<16x256xf32> to vector<16xf32>
    %66 = vector.shape_cast %65 : vector<16xf32> to vector<16x1xf32>
    %cst_17 = arith.constant 3.906250e-03 : f32
    %67 = vector.broadcast %cst_17 : f32 to vector<16x1xf32>
    %68 = arith.mulf %66, %67 : vector<16x1xf32>
    %69 = arith.mulf %63, %63 : vector<16x1xf32>
    %70 = arith.subf %68, %69 : vector<16x1xf32>
    %cst_18 = arith.constant 0.000000e+00 : f32
    %71 = vector.broadcast %cst_18 : f32 to vector<16x1xf32>
    %72 = arith.maximumf %70, %71 : vector<16x1xf32>
    %73 = vector.broadcast %63 : vector<16x1xf32> to vector<16x256xf32>
    %74 = arith.subf %59, %73 : vector<16x256xf32>
    %cst_19 = arith.constant 9.99999974E-6 : f32
    %75 = vector.broadcast %cst_19 : f32 to vector<16x1xf32>
    %76 = arith.addf %72, %75 : vector<16x1xf32>
    %77 = math.rsqrt %76 : vector<16x1xf32>
    %78 = vector.broadcast %77 : vector<16x1xf32> to vector<16x256xf32>
    %79 = arith.mulf %74, %78 : vector<16x256xf32>
    %c32 = arith.constant 32 : index
    %c0_20 = arith.constant 0 : index
    %80 = vector.load %arg1[%c32, %c0_20] : memref<48x81xf32, #tpu.memory_space<vmem>>, vector<8x81xf32>
    %c2_i32_21 = arith.constant 2 : i32
    %81 = tpu.dynamic_rotate %79 by %c2_i32_21 dim 1 : vector<16x256xf32>, i32 -> vector<16x256xf32>
    %82 = vector.broadcast %20 : vector<1x256xf32> to vector<16x256xf32>
    %83 = arith.mulf %81, %82 : vector<16x256xf32>
    %c1_i32_22 = arith.constant 1 : i32
    %84 = tpu.dynamic_rotate %79 by %c1_i32_22 dim 1 : vector<16x256xf32>, i32 -> vector<16x256xf32>
    %85 = vector.broadcast %24 : vector<1x256xf32> to vector<16x256xf32>
    %86 = arith.mulf %84, %85 : vector<16x256xf32>
    %c255_i32_23 = arith.constant 255 : i32
    %87 = tpu.dynamic_rotate %79 by %c255_i32_23 dim 1 : vector<16x256xf32>, i32 -> vector<16x256xf32>
    %88 = vector.broadcast %28 : vector<1x256xf32> to vector<16x256xf32>
    %89 = arith.mulf %87, %88 : vector<16x256xf32>
    %c254_i32_24 = arith.constant 254 : i32
    %90 = tpu.dynamic_rotate %79 by %c254_i32_24 dim 1 : vector<16x256xf32>, i32 -> vector<16x256xf32>
    %91 = vector.broadcast %32 : vector<1x256xf32> to vector<16x256xf32>
    %92 = arith.mulf %90, %91 : vector<16x256xf32>
    %93 = tpu.concatenate %83, %86, %79, %89, %92, %33 in 0 : vector<16x256xf32>, vector<16x256xf32>, vector<16x256xf32>, vector<16x256xf32>, vector<16x256xf32>, vector<1x256xf32> -> vector<81x256xf32>
    %cst_25 = arith.constant dense<0.000000e+00> : vector<8x256xf32>
    %94 = tpu.matmul %80, %93, %cst_25 {dimension_numbers = #tpu.dot_dimension_numbers<[1], [0], [0], [1], [0, 0, 1, 1], [], []>} : vector<8x81xf32>, vector<81x256xf32>, vector<8x256xf32> -> vector<8x256xf32>
    %c4_i32_26 = arith.constant 4 : i32
    %95 = tpu.dynamic_rotate %94 by %c4_i32_26 dim 0 : vector<8x256xf32>, i32 -> vector<8x256xf32>
    %cst_27 = arith.constant 0.000000e+00 : f32
    %96 = vector.broadcast %cst_27 : f32 to vector<8x256xf32>
    %97 = arith.select %36, %94, %96 : vector<8x256xi1>, vector<8x256xf32>
    %98 = math.exp %95 : vector<8x256xf32>
    %99 = arith.mulf %38, %98 : vector<8x256xf32>
    %100 = arith.addf %99, %97 : vector<8x256xf32>
    %c16_28 = arith.constant 16 : index
    %c0_29 = arith.constant 0 : index
    %101 = vector.load %arg1[%c16_28, %c0_29] : memref<48x81xf32, #tpu.memory_space<vmem>>, vector<16x41xf32>
    %c2_i32_30 = arith.constant 2 : i32
    %102 = tpu.dynamic_rotate %100 by %c2_i32_30 dim 1 : vector<8x256xf32>, i32 -> vector<8x256xf32>
    %103 = vector.broadcast %20 : vector<1x256xf32> to vector<8x256xf32>
    %104 = arith.mulf %102, %103 : vector<8x256xf32>
    %c1_i32_31 = arith.constant 1 : i32
    %105 = tpu.dynamic_rotate %100 by %c1_i32_31 dim 1 : vector<8x256xf32>, i32 -> vector<8x256xf32>
    %106 = vector.broadcast %24 : vector<1x256xf32> to vector<8x256xf32>
    %107 = arith.mulf %105, %106 : vector<8x256xf32>
    %c255_i32_32 = arith.constant 255 : i32
    %108 = tpu.dynamic_rotate %100 by %c255_i32_32 dim 1 : vector<8x256xf32>, i32 -> vector<8x256xf32>
    %109 = vector.broadcast %28 : vector<1x256xf32> to vector<8x256xf32>
    %110 = arith.mulf %108, %109 : vector<8x256xf32>
    %c254_i32_33 = arith.constant 254 : i32
    %111 = tpu.dynamic_rotate %100 by %c254_i32_33 dim 1 : vector<8x256xf32>, i32 -> vector<8x256xf32>
    %112 = vector.broadcast %32 : vector<1x256xf32> to vector<8x256xf32>
    %113 = arith.mulf %111, %112 : vector<8x256xf32>
    %114 = tpu.concatenate %104, %107, %100, %110, %113, %33 in 0 : vector<8x256xf32>, vector<8x256xf32>, vector<8x256xf32>, vector<8x256xf32>, vector<8x256xf32>, vector<1x256xf32> -> vector<41x256xf32>
    %cst_34 = arith.constant dense<0.000000e+00> : vector<16x256xf32>
    %115 = tpu.matmul %101, %114, %cst_34 {dimension_numbers = #tpu.dot_dimension_numbers<[1], [0], [0], [1], [0, 0, 1, 1], [], []>} : vector<16x41xf32>, vector<41x256xf32>, vector<16x256xf32> -> vector<16x256xf32>
    %cst_35 = arith.constant 0.000000e+00 : f32
    %116 = vector.broadcast %cst_35 : f32 to vector<16x256xf32>
    %117 = arith.cmpf oge, %115, %116 : vector<16x256xf32>
    %cst_36 = arith.constant 0.00999999977 : f32
    %118 = vector.broadcast %cst_36 : f32 to vector<16x256xf32>
    %119 = arith.mulf %118, %115 : vector<16x256xf32>
    %120 = arith.select %117, %115, %119 : vector<16x256xi1>, vector<16x256xf32>
    %cst_37 = arith.constant dense<0.000000e+00> : vector<16xf32>
    %121 = vector.multi_reduction <add>, %120, %cst_37 [1] : vector<16x256xf32> to vector<16xf32>
    %122 = vector.shape_cast %121 : vector<16xf32> to vector<16x1xf32>
    %cst_38 = arith.constant 3.906250e-03 : f32
    %123 = vector.broadcast %cst_38 : f32 to vector<16x1xf32>
    %124 = arith.mulf %122, %123 : vector<16x1xf32>
    %125 = arith.mulf %120, %120 : vector<16x256xf32>
    %cst_39 = arith.constant dense<0.000000e+00> : vector<16xf32>
    %126 = vector.multi_reduction <add>, %125, %cst_39 [1] : vector<16x256xf32> to vector<16xf32>
    %127 = vector.shape_cast %126 : vector<16xf32> to vector<16x1xf32>
    %cst_40 = arith.constant 3.906250e-03 : f32
    %128 = vector.broadcast %cst_40 : f32 to vector<16x1xf32>
    %129 = arith.mulf %127, %128 : vector<16x1xf32>
    %130 = arith.mulf %124, %124 : vector<16x1xf32>
    %131 = arith.subf %129, %130 : vector<16x1xf32>
    %cst_41 = arith.constant 0.000000e+00 : f32
    %132 = vector.broadcast %cst_41 : f32 to vector<16x1xf32>
    %133 = arith.maximumf %131, %132 : vector<16x1xf32>
    %134 = vector.broadcast %124 : vector<16x1xf32> to vector<16x256xf32>
    %135 = arith.subf %120, %134 : vector<16x256xf32>
    %cst_42 = arith.constant 9.99999974E-6 : f32
    %136 = vector.broadcast %cst_42 : f32 to vector<16x1xf32>
    %137 = arith.addf %133, %136 : vector<16x1xf32>
    %138 = math.rsqrt %137 : vector<16x1xf32>
    %139 = vector.broadcast %138 : vector<16x1xf32> to vector<16x256xf32>
    %140 = arith.mulf %135, %139 : vector<16x256xf32>
    %c40 = arith.constant 40 : index
    %c0_43 = arith.constant 0 : index
    %141 = vector.load %arg1[%c40, %c0_43] : memref<48x81xf32, #tpu.memory_space<vmem>>, vector<8x81xf32>
    %c2_i32_44 = arith.constant 2 : i32
    %142 = tpu.dynamic_rotate %140 by %c2_i32_44 dim 1 : vector<16x256xf32>, i32 -> vector<16x256xf32>
    %143 = vector.broadcast %20 : vector<1x256xf32> to vector<16x256xf32>
    %144 = arith.mulf %142, %143 : vector<16x256xf32>
    %c1_i32_45 = arith.constant 1 : i32
    %145 = tpu.dynamic_rotate %140 by %c1_i32_45 dim 1 : vector<16x256xf32>, i32 -> vector<16x256xf32>
    %146 = vector.broadcast %24 : vector<1x256xf32> to vector<16x256xf32>
    %147 = arith.mulf %145, %146 : vector<16x256xf32>
    %c255_i32_46 = arith.constant 255 : i32
    %148 = tpu.dynamic_rotate %140 by %c255_i32_46 dim 1 : vector<16x256xf32>, i32 -> vector<16x256xf32>
    %149 = vector.broadcast %28 : vector<1x256xf32> to vector<16x256xf32>
    %150 = arith.mulf %148, %149 : vector<16x256xf32>
    %c254_i32_47 = arith.constant 254 : i32
    %151 = tpu.dynamic_rotate %140 by %c254_i32_47 dim 1 : vector<16x256xf32>, i32 -> vector<16x256xf32>
    %152 = vector.broadcast %32 : vector<1x256xf32> to vector<16x256xf32>
    %153 = arith.mulf %151, %152 : vector<16x256xf32>
    %154 = tpu.concatenate %144, %147, %140, %150, %153, %33 in 0 : vector<16x256xf32>, vector<16x256xf32>, vector<16x256xf32>, vector<16x256xf32>, vector<16x256xf32>, vector<1x256xf32> -> vector<81x256xf32>
    %cst_48 = arith.constant dense<0.000000e+00> : vector<8x256xf32>
    %155 = tpu.matmul %141, %154, %cst_48 {dimension_numbers = #tpu.dot_dimension_numbers<[1], [0], [0], [1], [0, 0, 1, 1], [], []>} : vector<8x81xf32>, vector<81x256xf32>, vector<8x256xf32> -> vector<8x256xf32>
    %156 = arith.negf %155 : vector<8x256xf32>
    %157 = math.exp %156 : vector<8x256xf32>
    %cst_49 = arith.constant 1.000000e+00 : f32
    %158 = vector.broadcast %cst_49 : f32 to vector<8x256xf32>
    %159 = arith.addf %158, %157 : vector<8x256xf32>
    %160 = arith.divf %158, %159 : vector<8x256xf32>
    %cst_50 = arith.constant -1.000000e+01 : f32
    %cst_51 = arith.constant 0.000000e+00 : f32
    %161 = vector.broadcast %cst_50 : f32 to vector<8x256xf32>
    %162 = arith.maximumf %161, %155 : vector<8x256xf32>
    %163 = vector.broadcast %cst_51 : f32 to vector<8x256xf32>
    %164 = arith.minimumf %163, %162 : vector<8x256xf32>
    %165 = arith.select %36, %160, %164 : vector<8x256xi1>, vector<8x256xf32>
    %c4_i32_52 = arith.constant 4 : i32
    %166 = tpu.dynamic_rotate %165 by %c4_i32_52 dim 0 : vector<8x256xf32>, i32 -> vector<8x256xf32>
    %cst_53 = arith.constant 0.000000e+00 : f32
    %167 = vector.broadcast %cst_53 : f32 to vector<8x256xf32>
    %168 = arith.select %36, %165, %167 : vector<8x256xi1>, vector<8x256xf32>
    %169 = math.exp %166 : vector<8x256xf32>
    %170 = arith.mulf %39, %169 : vector<8x256xf32>
    %171 = arith.addf %170, %168 : vector<8x256xf32>
    %c0_54 = arith.constant 0 : index
    %c0_55 = arith.constant 0 : index
    %172 = vector.load %arg2[%c0_54, %c0_55] : memref<24x256xf32, #tpu.memory_space<vmem>>, vector<8x256xf32>
    tpu.vector_store %arg2[%c0_54, %c0_55], %171 {strides = array<i32>} : memref<24x256xf32, #tpu.memory_space<vmem>>, vector<8x256xf32>,
    %c8_56 = arith.constant 8 : index
    %c0_57 = arith.constant 0 : index
    %173 = vector.load %arg2[%c8_56, %c0_57] : memref<24x256xf32, #tpu.memory_space<vmem>>, vector<8x256xf32>
    tpu.vector_store %arg2[%c8_56, %c0_57], %165 {strides = array<i32>} : memref<24x256xf32, #tpu.memory_space<vmem>>, vector<8x256xf32>,
    %c16_58 = arith.constant 16 : index
    %c0_59 = arith.constant 0 : index
    %174 = vector.load %arg2[%c16_58, %c0_59] : memref<24x256xf32, #tpu.memory_space<vmem>>, vector<8x256xf32>
    tpu.vector_store %arg2[%c16_58, %c0_59], %94 {strides = array<i32>} : memref<24x256xf32, #tpu.memory_space<vmem>>, vector<8x256xf32>,
    return
  }
}

</mosaic_0001>

<bundles_post_ra>
// kernel: topvae_forward.1
= control target key start
LH: loop header
LB: loop body
LE: loop exit
PB: predicated region body
PF: predicated region fallthrough
CT: control target
= control target key end

     0   :  { %v868_v1 = vmov 0.0   ;;  %s869_s11 = smov 1   ;;  %s870_s12 = smov 2   ;;  %v11_v3 = vlaneseq  ;;  %vm116_vm10 = vcmask 1040384   ;;  %vm873_vm11 = vmmov 1   ;;  %s1262_s0 = inlined_call_operand.vmem [shape: f32[24,256], index: 0, kind: input, shape index: {}]   ;;  %s1263_s1 = inlined_call_operand.vmem [shape: f32[48,81], index: 1, kind: input, shape index: {}]   ;;  %s1264_s2 = inlined_call_operand.vmem [shape: f32[24,256], index: 2, kind: output, shape index: {}]  }
   0x1   :  { %v893_v0 = vld [vmem:[%s1262_s0] sm:$0xff]  ;;  %184 = vmatprep.mubr.f32.mxu0 %v868_v1  ;;  %380 = vmatprep.mubr.f32.mxu1 %v868_v1  ;;  %v66_v2 = vld [vmem:[%s1262_s0 + $0x8] sm:$0xff]  ;;  %s871_s15 = smov 127   ;;  %s872_s16 = smov 126   ;;  %vm976_vm12 = vmpackc.low %vm116_vm10, %vm873_vm11  ;;  %v874_v44 = vmov 1.0   ;;  %vm109_vm13 = vcmask 334848  }
   0x2   :  { %82 = vrot.lane.b32.xlu1 %v893_v0, %s869_s11  ;;  %73 = vrot.lane.b32.xlu0 %v893_v0, %s870_s12  ;;  %v913_v4 = vand.u32 127, %v11_v3  ;;  %v71_v47 = vld [vmem:[%s1263_s1] sm:$0xff]  ;;  %v72_v48 = vld [vmem:[%s1263_s1 + $0x8] sm:$0xff] }
   0x4   :  { %v13_v5 = vadd.s32 128, %v913_v4  ;;  %vm44_vm0 = vcmp.ge.s32.totalorder %v913_v4, 1  ;;  %vm38_vm1 = vcmp.ge.s32.totalorder %v913_v4, 2  ;;  %vm86_vm4 = vcmp.lt.s32.totalorder %v913_v4, 1 }
   0x5   :  { %vm77_vm5 = vcmp.lt.s32.totalorder %v913_v4, 2  ;;  %v921_v9 = vsel %vm44_vm0, 1.0, %v868_v1  ;;  %v924_v10 = vsel %vm38_vm1, 1.0, %v868_v1  ;;  %vm50_vm6 = vcmp.lt.s32.totalorder %v913_v4, 127 }
   0x6   :  { %84 = vrot.lane.b32.xlu1 %v66_v2, %s869_s11  ;;  %75 = vrot.lane.b32.xlu0 %v66_v2, %s870_s12  ;;  %v25_v6 = vand.u32 127, %v13_v5  ;;  %v948_v23 = vsel %vm50_vm6, 1.0, %v868_v1  ;;  %vm56_vm8 = vcmp.lt.s32.totalorder %v913_v4, 126  ;;  %v566_v4 = vld [vmem:[%s1263_s1 + $0x28] sm:$0xff] }
   0x7   :  { %v963_v33 = vsel %vm56_vm8, 1.0, %v868_v1 }
   0x8   :  { %vm39_vm2 = vcmp.ge.s32.totalorder %v25_v6, 2  ;;  %vm45_vm3 = vcmp.ge.s32.totalorder %v25_v6, 1  ;;  %vm51_vm7 = vcmp.lt.s32.totalorder %v25_v6, 127  ;;  %vm57_vm9 = vcmp.lt.s32.totalorder %v25_v6, 126 }
   0x9   :  { %v927_v11 = vsel %vm39_vm2, 1.0, %v868_v1  ;;  %v930_v12 = vsel %vm45_vm3, 1.0, %v868_v1  ;;  %v951_v24 = vsel %vm51_vm7, 1.0, %v868_v1  ;;  %v966_v34 = vsel %vm57_vm9, 1.0, %v868_v1 }
   0xa   :  { %93 = vrot.lane.b32.xlu1 %v66_v2, %s871_s15  ;;  %91 = vrot.lane.b32.xlu0 %v893_v0, %s871_s15  ;;  %vm312_vm2 = vcmask 662528  }
   0xe   :  { %102 = vrot.lane.b32.xlu1 %v66_v2, %s872_s16  ;;  %100 = vrot.lane.b32.xlu0 %v893_v0, %s872_s16 }
  0x74   :  { %v83_v7 = vpop.permute.xlu1 %82  ;;  %v74_v8 = vpop.permute.xlu0 %73 }
  0x78   :  { %v85_v13 = vpop.permute.xlu1 %84  ;;  %v76_v14 = vpop.permute.xlu0 %75 }
  0x79   :  { %v87_v15 = vsel %vm86_vm4, %v83_v7, %v85_v13  ;;  %v88_v16 = vsel %vm86_vm4, %v85_v13, %v83_v7  ;;  %v78_v17 = vsel %vm77_vm5, %v74_v8, %v76_v14  ;;  %v79_v18 = vsel %vm77_vm5, %v76_v14, %v74_v8 }
  0x7a   :  { %v89_v19 = vmul.f32 %v921_v9, %v88_v16  ;;  %v80_v20 = vmul.f32 %v924_v10, %v79_v18  ;;  %v81_v21 = vmul.f32 %v927_v11, %v78_v17  ;;  %v90_v22 = vmul.f32 %v930_v12, %v87_v15 }
  0x7c   :  { %v94_v25 = vpop.permute.xlu1 %93  ;;  %v92_v26 = vpop.permute.xlu0 %91  ;;  %v769_v27 = vpack.c.bf16 %v90_v22, %v81_v21  ;;  %v771_v28 = vpack.c.bf16 %v89_v19, %v80_v20 }
  0x7d   :  { %v96_v29 = vsel %vm50_vm6, %v92_v26, %v94_v25  ;;  %v97_v30 = vsel %vm50_vm6, %v94_v25, %v92_v26 }
  0x7e   :  { %v98_v31 = vmul.f32 %v948_v23, %v96_v29  ;;  %v99_v32 = vmul.f32 %v951_v24, %v97_v30  ;;  %770 = vmatprep.subr.bf16.mxu0 %v769_v27 }
  0x7f   :  { %772 = vmatpush1.bf16.msra.mxu0 %v771_v28 }
  0x80   :  { %v103_v35 = vpop.permute.xlu1 %102  ;;  %v101_v36 = vpop.permute.xlu0 %100  ;;  %v773_v37 = vpack.c.bf16 %v99_v32, %v66_v2  ;;  %v775_v38 = vpack.c.bf16 %v98_v31, %v893_v0 }
  0x81   :  { %v105_v39 = vsel %vm56_vm8, %v101_v36, %v103_v35  ;;  %v106_v40 = vsel %vm56_vm8, %v103_v35, %v101_v36 }
  0x82   :  { %v107_v41 = vmul.f32 %v963_v33, %v105_v39  ;;  %v108_v42 = vmul.f32 %v966_v34, %v106_v40  ;;  %774 = vmatprep.subr.bf16.mxu0 %v773_v37 }
  0x83   :  { %776 = vmatpush1.bf16.msra.mxu0 %v775_v38 }
  0x84   :  { %v777_v45 = vpack.c.bf16 %v874_v44, %v108_v42  ;;  %v780_v46 = vpack.c.bf16 %v874_v44, %v107_v41 }
  0x86   :  { %779 = vmatprep.subr.msk.bf16.mxu0 %vm976_vm12, %v777_v45 }
  0x87   :  { %782 = vmatpush1.bf16.msk.msra.mxu0 %vm976_vm12, %v780_v46 }
  0x8a   :  { %755 = vmatmul.mubr.msk.f32.vlgmr.msra.gmra.mrb[0].mxu0 %vm109_vm13, %v71_v47 }
  0x8b   :  { %190 = vmatprep.mubr.f32.mxu0 %v868_v1 }
  0x8e   :  { %756 = vmatmul.mubr.msk.f32.gmra.mrb[2].mxu0 %vm109_vm13, %v72_v48 }
  0x8f   :  { %503 = vmatprep.mubr.f32.mxu0 %v868_v1 }
 0x15d   :  { %v186_v49 = vpop.f32.mrb[0].mxu0 }
 0x15e   :  { %vm197_vm14 = vcmp.ge.f32.partialorder %v186_v49, 0.0  ;;  %v201_v50 = vmul.f32 0.01, %v186_v49  ;;  %v188_v51 = vpop.f32.mrb[1].mxu0 }
 0x15f   :  { %vm198_vm15 = vcmp.ge.f32.partialorder %v188_v51, 0.0  ;;  %v202_v52 = vmul.f32 0.01, %v188_v51 }
 0x160   :  { %v205_v53 = vsel %vm197_vm14, %v186_v49, %v201_v50 }
 0x161   :  { %v206_v54 = vsel %vm198_vm15, %v188_v51, %v202_v52  ;;  %v192_v55 = vpop.f32.mrb[2].mxu0  ;;  %v217_v56 = vmul.f32 %v205_v53, %v205_v53 }
 0x162   :  { %vm199_vm0 = vcmp.ge.f32.partialorder %v192_v55, 0.0  ;;  %v203_v57 = vmul.f32 0.01, %v192_v55  ;;  %v194_v58 = vpop.f32.mrb[3].mxu0  ;;  %v209_v59 = vadd.f32 %v206_v54, %v205_v53  ;;  %v218_v60 = vmul.f32 %v206_v54, %v206_v54 }
 0x163   :  { %vm200_vm1 = vcmp.ge.f32.partialorder %v194_v58, 0.0  ;;  %v204_v61 = vmul.f32 0.01, %v194_v58 }
 0x164   :  { %v207_v62 = vsel %vm199_vm0, %v192_v55, %v203_v57  ;;  %210 = vadd.xlane.f32.xlu0 %v209_v59  ;;  %v221_v2 = vadd.f32 %v218_v60, %v217_v56 }
 0x165   :  { %v208_v63 = vsel %vm200_vm1, %v194_v58, %v204_v61  ;;  %v219_v0 = vmul.f32 %v207_v62, %v207_v62 }
 0x166   :  { %v212_v5 = vadd.f32 %v208_v63, %v207_v62  ;;  %v220_v6 = vmul.f32 %v208_v63, %v208_v63 }
 0x168   :  { %222 = vadd.xlane.f32.xlu0 %v221_v2  ;;  %213 = vadd.xlane.f32.xlu1 %v212_v5  ;;  %v224_v7 = vadd.f32 %v220_v6, %v219_v0 }
 0x16c   :  { %225 = vadd.xlane.f32.xlu0 %v224_v7 }
 0x1f1   :  { %v211_v8 = vpop.xlane.xlu0 %210 }
 0x1f2   :  { %v215_v13 = vmul.f32 0.00390625, %v211_v8 }
 0x1f4   :  { %v229_v16 = vmul.f32 %v215_v13, %v215_v13  ;;  %v235_v30 = vsub.f32 %v205_v53, %v215_v13  ;;  %v236_v35 = vsub.f32 %v206_v54, %v215_v13 }
 0x1f5   :  { %v223_v14 = vpop.xlane.xlu0 %222  ;;  %v214_v15 = vpop.xlane.xlu1 %213 }
 0x1f6   :  { %v227_v17 = vmul.f32 0.00390625, %v223_v14  ;;  %v216_v18 = vmul.f32 0.00390625, %v214_v15 }
 0x1f8   :  { %v231_v19 = vsub.f32 %v227_v17, %v229_v16  ;;  %v230_v20 = vmul.f32 %v216_v18, %v216_v18  ;;  %v237_v36 = vsub.f32 %v207_v62, %v216_v18  ;;  %v238_v37 = vsub.f32 %v208_v63, %v216_v18 }
 0x1f9   :  { %v226_v21 = vpop.xlane.xlu0 %225 }
 0x1fa   :  { %v233_v22 = vmax.f32 %v231_v19, 0.0  ;;  %v228_v25 = vmul.f32 0.00390625, %v226_v21 }
 0x1fc   :  { %v239_v26 = vadd.f32 1e-05, %v233_v22  ;;  %v232_v27 = vsub.f32 %v228_v25, %v230_v20 }
 0x1fe   :  { %844 = vrsqrt.f32 %v239_v26  ;;  %v234_v28 = vmax.f32 %v232_v27, 0.0 }
 0x200   :  { %v240_v29 = vadd.f32 1e-05, %v234_v28 }
 0x202   :  { %846 = vrsqrt.f32 %v240_v29 }
 0x208   :  { %v845_v31 = vpop.eup %844 }
 0x209   :  { %v996_v32 = vmul.f32 %v845_v31, %v235_v30  ;;  %v244_v39 = vmul.f32 %v845_v31, %v236_v35 }
 0x20b   :  { %264 = vrot.lane.b32.xlu0 %v996_v32, %s869_s11  ;;  %248 = vrot.lane.b32.xlu1 %v996_v32, %s870_s12 }
 0x20c   :  { %v847_v38 = vpop.eup %846 }
 0x20d   :  { %v246_v40 = vmul.f32 %v847_v38, %v238_v37  ;;  %v1002_v41 = vmul.f32 %v847_v38, %v237_v36 }
 0x20f   :  { %268 = vrot.lane.b32.xlu0 %v244_v39, %s869_s11  ;;  %252 = vrot.lane.b32.xlu1 %v244_v39, %s870_s12  ;;  %v791_v42 = vpack.c.bf16 %v246_v40, %v244_v39  ;;  %v793_v45 = vpack.c.bf16 %v1002_v41, %v996_v32 }
 0x213   :  { %254 = vrot.lane.b32.xlu1 %v246_v40, %s870_s12  ;;  %250 = vrot.lane.b32.xlu0 %v1002_v41, %s870_s12 }
 0x217   :  { %266 = vrot.lane.b32.xlu1 %v1002_v41, %s869_s11  ;;  %280 = vrot.lane.b32.xlu0 %v996_v32, %s871_s15 }
 0x21b   :  { %270 = vrot.lane.b32.xlu1 %v246_v40, %s869_s11  ;;  %284 = vrot.lane.b32.xlu0 %v244_v39, %s871_s15 }
 0x21f   :  { %282 = vrot.lane.b32.xlu1 %v1002_v41, %s871_s15  ;;  %296 = vrot.lane.b32.xlu0 %v996_v32, %s872_s16 }
 0x223   :  { %286 = vrot.lane.b32.xlu1 %v246_v40, %s871_s15  ;;  %300 = vrot.lane.b32.xlu0 %v244_v39, %s872_s16 }
 0x227   :  { %298 = vrot.lane.b32.xlu1 %v1002_v41, %s872_s16 }
 0x22b   :  { %302 = vrot.lane.b32.xlu1 %v246_v40, %s872_s16 }
 0x27d   :  { %v265_v46 = vpop.permute.xlu0 %264  ;;  %v249_v47 = vpop.permute.xlu1 %248 }
 0x281   :  { %v269_v48 = vpop.permute.xlu0 %268  ;;  %v253_v49 = vpop.permute.xlu1 %252 }
 0x282   :  { %v256_v50 = vsel %vm77_vm5, %v249_v47, %v253_v49  ;;  %v258_v51 = vsel %vm77_vm5, %v253_v49, %v249_v47  ;;  %v272_v0 = vsel %vm86_vm4, %v265_v46, %v269_v48  ;;  %v274_v2 = vsel %vm86_vm4, %v269_v48, %v265_v46 }
 0x283   :  { %v260_v56 = vmul.f32 %v924_v10, %v258_v51  ;;  %v261_v58 = vmul.f32 %v927_v11, %v256_v50  ;;  %v276_v13 = vmul.f32 %v921_v9, %v274_v2  ;;  %v277_v14 = vmul.f32 %v930_v12, %v272_v0  ;;  %v247_v51 = vld [vmem:[%s1263_s1 + $0x20] sm:$0xff] }
 0x285   :  { %v251_v52 = vpop.permute.xlu0 %250  ;;  %v255_v53 = vpop.permute.xlu1 %254 }
 0x286   :  { %v257_v54 = vsel %vm77_vm5, %v251_v52, %v255_v53  ;;  %v259_v55 = vsel %vm77_vm5, %v255_v53, %v251_v52 }
 0x287   :  { %v262_v57 = vmul.f32 %v924_v10, %v259_v55  ;;  %v263_v59 = vmul.f32 %v927_v11, %v257_v54 }
 0x289   :  { %v281_v60 = vpop.permute.xlu0 %280  ;;  %v267_v61 = vpop.permute.xlu1 %266  ;;  %v783_v62 = vpack.c.bf16 %v263_v59, %v261_v58  ;;  %v785_v63 = vpack.c.bf16 %v262_v57, %v260_v56  ;;  %v1090_v58 = vshrl.u32 %v11_v3, 7  ;;  %v67_v59 = vld [vmem:[%s1262_s0 + $0x10] sm:$0xff] }
 0x28b   :  { %784 = vmatprep.subr.bf16.mxu1 %v783_v62  ;;  %vm64_vm3 = vcmp.lt.s32.totalorder %v1090_v58, 4 }
 0x28c   :  { %786 = vmatpush1.bf16.msra.mxu1 %v785_v63 }
 0x28d   :  { %v285_v5 = vpop.permute.xlu0 %284  ;;  %v271_v6 = vpop.permute.xlu1 %270 }
 0x28e   :  { %v273_v7 = vsel %vm86_vm4, %v267_v61, %v271_v6  ;;  %v275_v8 = vsel %vm86_vm4, %v271_v6, %v267_v61  ;;  %v288_v21 = vsel %vm50_vm6, %v281_v60, %v285_v5  ;;  %v290_v22 = vsel %vm50_vm6, %v285_v5, %v281_v60  ;;  %v68_v60 = vld [vmem:[%s1262_s0 + $0x18] sm:$0xff] }
 0x28f   :  { %v278_v15 = vmul.f32 %v921_v9, %v275_v8  ;;  %v279_v16 = vmul.f32 %v930_v12, %v273_v7  ;;  %v292_v28 = vmul.f32 %v948_v23, %v288_v21  ;;  %v293_v29 = vmul.f32 %v951_v24, %v290_v22 }
 0x291   :  { %v283_v17 = vpop.permute.xlu1 %282  ;;  %v787_v18 = vpack.c.bf16 %v279_v16, %v277_v14  ;;  %v789_v19 = vpack.c.bf16 %v278_v15, %v276_v13  ;;  %v297_v20 = vpop.permute.xlu0 %296 }
 0x293   :  { %788 = vmatprep.subr.bf16.mxu1 %v787_v18 }
 0x294   :  { %790 = vmatpush1.bf16.msra.mxu1 %v789_v19 }
 0x295   :  { %792 = vmatprep.subr.bf16.mxu1 %v791_v42  ;;  %v287_v25 = vpop.permute.xlu1 %286  ;;  %v301_v32 = vpop.permute.xlu0 %300 }
 0x296   :  { %v289_v26 = vsel %vm50_vm6, %v283_v17, %v287_v25  ;;  %v291_v27 = vsel %vm50_vm6, %v287_v25, %v283_v17  ;;  %v304_v38 = vsel %vm56_vm8, %v297_v20, %v301_v32  ;;  %v306_v39 = vsel %vm56_vm8, %v301_v32, %v297_v20 }
 0x297   :  { %v294_v30 = vmul.f32 %v948_v23, %v289_v26  ;;  %v295_v31 = vmul.f32 %v951_v24, %v291_v27  ;;  %v309_v46 = vmul.f32 %v966_v34, %v306_v39 }
 0x298   :  { %794 = vmatpush1.bf16.msra.mxu1 %v793_v45  ;;  %v308_v45 = vmul.f32 %v963_v33, %v304_v38 }
 0x299   :  { %v299_v35 = vpop.permute.xlu1 %298  ;;  %v795_v36 = vpack.c.bf16 %v295_v31, %v293_v29  ;;  %v797_v37 = vpack.c.bf16 %v294_v30, %v292_v28 }
 0x29b   :  { %796 = vmatprep.subr.bf16.mxu1 %v795_v36 }
 0x29c   :  { %798 = vmatpush1.bf16.msra.mxu1 %v797_v37 }
 0x29d   :  { %v303_v40 = vpop.permute.xlu1 %302 }
 0x29e   :  { %v305_v41 = vsel %vm56_vm8, %v299_v35, %v303_v40  ;;  %v307_v42 = vsel %vm56_vm8, %v303_v40, %v299_v35 }
 0x29f   :  { %v310_v47 = vmul.f32 %v963_v33, %v305_v41  ;;  %v311_v48 = vmul.f32 %v966_v34, %v307_v42 }
 0x2a1   :  { %v799_v49 = vpack.c.bf16 %v311_v48, %v309_v46  ;;  %v801_v50 = vpack.c.bf16 %v310_v47, %v308_v45  ;;  %v399_v47 = vld [vmem:[%s1263_s1 + $0x10] sm:$0xff]  ;;  %v400_v48 = vld [vmem:[%s1263_s1 + $0x18] sm:$0xff] }
 0x2a3   :  { %800 = vmatprep.subr.bf16.mxu1 %v799_v49 }
 0x2a4   :  { %802 = vmatpush1.bf16.msra.mxu1 %v801_v50 }
 0x2a5   :  { %757 = vmatprep.subr.msk.mxu1 %vm116_vm10, %v874_v44 }
 0x2a8   :  { %758 = vmatpush1.msk.msra.mxu1 %vm116_vm10, %v874_v44 }
 0x2a9   :  { %759 = vmatmul.mubr.msk.f32.vlgmr.msra.gmra.mrb[0].mxu1 %vm312_vm2, %v247_v51 }
 0x2aa   :  { %698 = vmatprep.mubr.f32.mxu1 %v868_v1 }
 0x37c   :  { %v382_v52 = vpop.f32.mrb[0].mxu1 }
 0x37d   :  { %v387_v53 = vrot.slane %v382_v52, 4  ;;  %739 = vst [vmem:[%s1264_s2 + $0x20] sm:$0xff] %v382_v52  ;;  %v384_v54 = vpop.f32.mrb[1].mxu1  ;;  %v389_v0 = vsel %vm64_vm3, %v382_v52, 0.0 }
 0x37e   :  { %v388_v55 = vrot.slane %v384_v54, 4  ;;  %740 = vst [vmem:[%s1264_s2 + $0x28] sm:$0xff] %v384_v54  ;;  %v390_v3 = vsel %vm64_vm3, %v384_v54, 0.0 }
 0x37f   :  { %v391_v56 = vmul.f32 1.442695, %v387_v53 }
 0x380   :  { %v393_v57 = vmul.f32 1.442695, %v388_v55 }
 0x381   :  { %848 = vpow2.f32 %v391_v56 }
 0x382   :  { %850 = vpow2.f32 %v393_v57 }
 0x38b   :  { %v849_v61 = vpop.eup %848 }
 0x38c   :  { %v851_v62 = vpop.eup %850  ;;  %v395_v63 = vmul.f32 %v849_v61, %v67_v59 }
 0x38d   :  { %v396_v2 = vmul.f32 %v851_v62, %v68_v60 }
 0x38e   :  { %v397_v5 = vadd.f32 %v395_v63, %v389_v0 }
 0x38f   :  { %v398_v6 = vadd.f32 %v396_v2, %v390_v3 }
 0x390   :  { %401 = vrot.lane.b32.xlu0 %v397_v5, %s870_s12 }
 0x391   :  { %403 = vrot.lane.b32.xlu1 %v398_v6, %s870_s12 }
 0x394   :  { %409 = vrot.lane.b32.xlu0 %v397_v5, %s869_s11 }
 0x395   :  { %411 = vrot.lane.b32.xlu1 %v398_v6, %s869_s11 }
 0x398   :  { %417 = vrot.lane.b32.xlu0 %v397_v5, %s871_s15 }
 0x399   :  { %419 = vrot.lane.b32.xlu1 %v398_v6, %s871_s15 }
 0x39c   :  { %425 = vrot.lane.b32.xlu0 %v397_v5, %s872_s16 }
 0x39d   :  { %427 = vrot.lane.b32.xlu1 %v398_v6, %s872_s16 }
 0x402   :  { %v402_v7 = vpop.permute.xlu0 %401 }
 0x403   :  { %v404_v8 = vpop.permute.xlu1 %403 }
 0x404   :  { %v405_v13 = vsel %vm77_vm5, %v402_v7, %v404_v8  ;;  %v406_v14 = vsel %vm77_vm5, %v404_v8, %v402_v7 }
 0x405   :  { %v407_v19 = vmul.f32 %v924_v10, %v406_v14  ;;  %v408_v20 = vmul.f32 %v927_v11, %v405_v13 }
 0x406   :  { %v410_v15 = vpop.permute.xlu0 %409 }
 0x407   :  { %v412_v16 = vpop.permute.xlu1 %411 }
 0x408   :  { %v413_v17 = vsel %vm86_vm4, %v410_v15, %v412_v16  ;;  %v414_v18 = vsel %vm86_vm4, %v412_v16, %v410_v15 }
 0x409   :  { %v415_v21 = vmul.f32 %v921_v9, %v414_v18  ;;  %v416_v22 = vmul.f32 %v930_v12, %v413_v17 }
 0x40a   :  { %v418_v25 = vpop.permute.xlu0 %417 }
 0x40b   :  { %v805_v26 = vpack.c.bf16 %v415_v21, %v407_v19  ;;  %v420_v27 = vpop.permute.xlu1 %419  ;;  %v803_v28 = vpack.c.bf16 %v416_v22, %v408_v20 }
 0x40c   :  { %v421_v29 = vsel %vm50_vm6, %v418_v25, %v420_v27  ;;  %v422_v30 = vsel %vm50_vm6, %v420_v27, %v418_v25 }
 0x40d   :  { %v423_v31 = vmul.f32 %v948_v23, %v421_v29  ;;  %v424_v32 = vmul.f32 %v951_v24, %v422_v30  ;;  %804 = vmatprep.subr.bf16.mxu0 %v803_v28 }
 0x40e   :  { %v426_v35 = vpop.permute.xlu0 %425  ;;  %806 = vmatpush1.bf16.msra.mxu0 %v805_v26 }
 0x40f   :  { %v809_v36 = vpack.c.bf16 %v423_v31, %v397_v5  ;;  %v428_v37 = vpop.permute.xlu1 %427  ;;  %v807_v38 = vpack.c.bf16 %v424_v32, %v398_v6 }
 0x410   :  { %v429_v39 = vsel %vm56_vm8, %v426_v35, %v428_v37  ;;  %v430_v40 = vsel %vm56_vm8, %v428_v37, %v426_v35 }
 0x411   :  { %v431_v41 = vmul.f32 %v963_v33, %v429_v39  ;;  %v432_v42 = vmul.f32 %v966_v34, %v430_v40  ;;  %808 = vmatprep.subr.bf16.mxu0 %v807_v38 }
 0x412   :  { %810 = vmatpush1.bf16.msra.mxu0 %v809_v36 }
 0x413   :  { %v811_v45 = vpack.c.bf16 %v874_v44, %v432_v42  ;;  %v814_v46 = vpack.c.bf16 %v874_v44, %v431_v41 }
 0x415   :  { %813 = vmatprep.subr.msk.bf16.mxu0 %vm976_vm12, %v811_v45 }
 0x416   :  { %816 = vmatpush1.bf16.msk.msra.mxu0 %vm976_vm12, %v814_v46 }
 0x419   :  { %762 = vmatmul.mubr.msk.f32.vlgmr.msra.gmra.mrb[4].mxu0 %vm109_vm13, %v399_v47 }
 0x41a   :  { %509 = vmatprep.mubr.f32.mxu0 %v868_v1 }
 0x41d   :  { %763 = vmatmul.mubr.msk.f32.gmra.mrb[6].mxu0 %vm109_vm13, %v400_v48 }
 0x4ec   :  { %v505_v49 = vpop.f32.mrb[4].mxu0 }
 0x4ed   :  { %vm516_vm7 = vcmp.ge.f32.partialorder %v505_v49, 0.0  ;;  %v520_v50 = vmul.f32 0.01, %v505_v49  ;;  %v507_v51 = vpop.f32.mrb[5].mxu0 }
 0x4ee   :  { %vm517_vm9 = vcmp.ge.f32.partialorder %v507_v51, 0.0  ;;  %v521_v43 = vmul.f32 0.01, %v507_v51 }
 0x4ef   :  { %v524_v52 = vsel %vm516_vm7, %v505_v49, %v520_v50 }
 0x4f0   :  { %v525_v53 = vsel %vm517_vm9, %v507_v51, %v521_v43  ;;  %v511_v54 = vpop.f32.mrb[6].mxu0  ;;  %v536_v55 = vmul.f32 %v524_v52, %v524_v52 }
 0x4f1   :  { %vm518_vm11 = vcmp.ge.f32.partialorder %v511_v54, 0.0  ;;  %v522_v56 = vmul.f32 0.01, %v511_v54  ;;  %v513_v57 = vpop.f32.mrb[7].mxu0  ;;  %v528_v1 = vadd.f32 %v525_v53, %v524_v52  ;;  %v537_v59 = vmul.f32 %v525_v53, %v525_v53 }
 0x4f2   :  { %vm519_vm12 = vcmp.ge.f32.partialorder %v513_v57, 0.0  ;;  %v523_v60 = vmul.f32 0.01, %v513_v57 }
 0x4f3   :  { %v526_v61 = vsel %vm518_vm11, %v511_v54, %v522_v56  ;;  %529 = vadd.xlane.f32.xlu0 %v528_v1  ;;  %v540_v0 = vadd.f32 %v537_v59, %v536_v55 }
 0x4f4   :  { %v527_v62 = vsel %vm519_vm12, %v513_v57, %v523_v60  ;;  %v538_v63 = vmul.f32 %v526_v61, %v526_v61 }
 0x4f5   :  { %v531_v2 = vadd.f32 %v527_v62, %v526_v61  ;;  %v539_v5 = vmul.f32 %v527_v62, %v527_v62 }
 0x4f7   :  { %541 = vadd.xlane.f32.xlu0 %v540_v0  ;;  %532 = vadd.xlane.f32.xlu1 %v531_v2  ;;  %v543_v3 = vadd.f32 %v539_v5, %v538_v63 }
 0x4fb   :  { %544 = vadd.xlane.f32.xlu0 %v543_v3 }
 0x580   :  { %v530_v6 = vpop.xlane.xlu0 %529 }
 0x581   :  { %v534_v7 = vmul.f32 0.00390625, %v530_v6 }
 0x583   :  { %v548_v14 = vmul.f32 %v534_v7, %v534_v7  ;;  %v554_v28 = vsub.f32 %v524_v52, %v534_v7  ;;  %v555_v31 = vsub.f32 %v525_v53, %v534_v7 }
 0x584   :  { %v542_v8 = vpop.xlane.xlu0 %541  ;;  %v533_v13 = vpop.xlane.xlu1 %532 }
 0x585   :  { %v546_v15 = vmul.f32 0.00390625, %v542_v8  ;;  %v535_v16 = vmul.f32 0.00390625, %v533_v13 }
 0x587   :  { %v550_v17 = vsub.f32 %v546_v15, %v548_v14  ;;  %v549_v18 = vmul.f32 %v535_v16, %v535_v16  ;;  %v556_v32 = vsub.f32 %v526_v61, %v535_v16  ;;  %v557_v35 = vsub.f32 %v527_v62, %v535_v16 }
 0x588   :  { %v545_v19 = vpop.xlane.xlu0 %544 }
 0x589   :  { %v552_v20 = vmax.f32 %v550_v17, 0.0  ;;  %v547_v21 = vmul.f32 0.00390625, %v545_v19 }
 0x58b   :  { %v558_v22 = vadd.f32 1e-05, %v552_v20  ;;  %v551_v25 = vsub.f32 %v547_v21, %v549_v18 }
 0x58d   :  { %852 = vrsqrt.f32 %v558_v22  ;;  %v553_v26 = vmax.f32 %v551_v25, 0.0 }
 0x58f   :  { %v559_v27 = vadd.f32 1e-05, %v553_v26 }
 0x591   :  { %854 = vrsqrt.f32 %v559_v27 }
 0x597   :  { %v853_v29 = vpop.eup %852 }
 0x598   :  { %v1150_v30 = vmul.f32 %v853_v29, %v554_v28  ;;  %v563_v37 = vmul.f32 %v853_v29, %v555_v31 }
 0x59a   :  { %583 = vrot.lane.b32.xlu0 %v1150_v30, %s869_s11  ;;  %567 = vrot.lane.b32.xlu1 %v1150_v30, %s870_s12 }
 0x59b   :  { %v855_v36 = vpop.eup %854 }
 0x59c   :  { %v565_v38 = vmul.f32 %v855_v36, %v557_v35  ;;  %v1156_v39 = vmul.f32 %v855_v36, %v556_v32 }
 0x59e   :  { %587 = vrot.lane.b32.xlu0 %v563_v37, %s869_s11  ;;  %571 = vrot.lane.b32.xlu1 %v563_v37, %s870_s12  ;;  %v825_v40 = vpack.c.bf16 %v565_v38, %v563_v37  ;;  %v827_v41 = vpack.c.bf16 %v1156_v39, %v1150_v30 }
 0x5a2   :  { %573 = vrot.lane.b32.xlu1 %v565_v38, %s870_s12  ;;  %569 = vrot.lane.b32.xlu0 %v1156_v39, %s870_s12 }
 0x5a6   :  { %585 = vrot.lane.b32.xlu1 %v1156_v39, %s869_s11  ;;  %599 = vrot.lane.b32.xlu0 %v1150_v30, %s871_s15 }
 0x5aa   :  { %589 = vrot.lane.b32.xlu1 %v565_v38, %s869_s11  ;;  %603 = vrot.lane.b32.xlu0 %v563_v37, %s871_s15 }
 0x5ae   :  { %601 = vrot.lane.b32.xlu1 %v1156_v39, %s871_s15  ;;  %615 = vrot.lane.b32.xlu0 %v1150_v30, %s872_s16 }
 0x5b2   :  { %605 = vrot.lane.b32.xlu1 %v565_v38, %s871_s15  ;;  %619 = vrot.lane.b32.xlu0 %v563_v37, %s872_s16 }
 0x5b6   :  { %617 = vrot.lane.b32.xlu1 %v1156_v39, %s872_s16 }
 0x5ba   :  { %621 = vrot.lane.b32.xlu1 %v565_v38, %s872_s16 }
 0x60c   :  { %v584_v42 = vpop.permute.xlu0 %583  ;;  %v568_v45 = vpop.permute.xlu1 %567 }
 0x610   :  { %v588_v46 = vpop.permute.xlu0 %587  ;;  %v572_v47 = vpop.permute.xlu1 %571 }
 0x611   :  { %v575_v48 = vsel %vm77_vm5, %v568_v45, %v572_v47  ;;  %v577_v49 = vsel %vm77_vm5, %v572_v47, %v568_v45  ;;  %v591_v61 = vsel %vm86_vm4, %v584_v42, %v588_v46  ;;  %v593_v62 = vsel %vm86_vm4, %v588_v46, %v584_v42 }
 0x612   :  { %v579_v53 = vmul.f32 %v924_v10, %v577_v49  ;;  %v580_v54 = vmul.f32 %v927_v11, %v575_v48  ;;  %v596_v5 = vmul.f32 %v930_v12, %v591_v61 }
 0x614   :  { %v570_v50 = vpop.permute.xlu0 %569  ;;  %v574_v51 = vpop.permute.xlu1 %573 }
 0x615   :  { %v576_v43 = vsel %vm77_vm5, %v570_v50, %v574_v51  ;;  %v578_v52 = vsel %vm77_vm5, %v574_v51, %v570_v50 }
 0x616   :  { %v581_v55 = vmul.f32 %v924_v10, %v578_v52  ;;  %v582_v56 = vmul.f32 %v927_v11, %v576_v43  ;;  %v595_v11 = vmul.f32 %v921_v9, %v593_v62 }
 0x618   :  { %v819_v57 = vpack.c.bf16 %v581_v55, %v579_v53  ;;  %v600_v1 = vpop.permute.xlu0 %599  ;;  %v586_v59 = vpop.permute.xlu1 %585  ;;  %v817_v60 = vpack.c.bf16 %v582_v56, %v580_v54 }
 0x61a   :  { %818 = vmatprep.subr.bf16.mxu1 %v817_v60 }
 0x61b   :  { %820 = vmatpush1.bf16.msra.mxu1 %v819_v57  ;;  %v69_v57 = vld [vmem:[%s1262_s0 + $0x20] sm:$0xff] }
 0x61c   :  { %v604_v63 = vpop.permute.xlu0 %603  ;;  %v590_v0 = vpop.permute.xlu1 %589 }
 0x61d   :  { %v592_v2 = vsel %vm86_vm4, %v586_v59, %v590_v0  ;;  %v594_v10 = vsel %vm86_vm4, %v590_v0, %v586_v59  ;;  %v607_v15 = vsel %vm50_vm6, %v600_v1, %v604_v63  ;;  %v609_v16 = vsel %vm50_vm6, %v604_v63, %v600_v1  ;;  %v70_v1 = vld [vmem:[%s1262_s0 + $0x28] sm:$0xff] }
 0x61e   :  { %v597_v3 = vmul.f32 %v921_v9, %v594_v10  ;;  %v598_v6 = vmul.f32 %v930_v12, %v592_v2  ;;  %v611_v12 = vmul.f32 %v948_v23, %v607_v15  ;;  %v612_v19 = vmul.f32 %v951_v24, %v609_v16 }
 0x620   :  { %v823_v7 = vpack.c.bf16 %v597_v3, %v595_v11  ;;  %v602_v8 = vpop.permute.xlu1 %601  ;;  %v821_v13 = vpack.c.bf16 %v598_v6, %v596_v5  ;;  %v616_v14 = vpop.permute.xlu0 %615 }
 0x622   :  { %822 = vmatprep.subr.bf16.mxu1 %v821_v13 }
 0x623   :  { %824 = vmatpush1.bf16.msra.mxu1 %v823_v7 }
 0x624   :  { %826 = vmatprep.subr.bf16.mxu1 %v825_v40  ;;  %v606_v17 = vpop.permute.xlu1 %605  ;;  %v620_v22 = vpop.permute.xlu0 %619 }
 0x625   :  { %v608_v18 = vsel %vm50_vm6, %v602_v8, %v606_v17  ;;  %v610_v9 = vsel %vm50_vm6, %v606_v17, %v602_v8  ;;  %v623_v28 = vsel %vm56_vm8, %v616_v14, %v620_v22  ;;  %v625_v29 = vsel %vm56_vm8, %v620_v22, %v616_v14 }
 0x626   :  { %v613_v20 = vmul.f32 %v948_v23, %v608_v18  ;;  %v614_v21 = vmul.f32 %v951_v24, %v610_v9  ;;  %v627_v24 = vmul.f32 %v963_v33, %v623_v28  ;;  %v628_v32 = vmul.f32 %v966_v34, %v625_v29 }
 0x627   :  { %828 = vmatpush1.bf16.msra.mxu1 %v827_v41 }
 0x628   :  { %v831_v25 = vpack.c.bf16 %v613_v20, %v611_v12  ;;  %v618_v26 = vpop.permute.xlu1 %617  ;;  %v829_v27 = vpack.c.bf16 %v614_v21, %v612_v19 }
 0x62a   :  { %830 = vmatprep.subr.bf16.mxu1 %v829_v27 }
 0x62b   :  { %832 = vmatpush1.bf16.msra.mxu1 %v831_v25 }
 0x62c   :  { %v622_v30 = vpop.permute.xlu1 %621 }
 0x62d   :  { %v624_v31 = vsel %vm56_vm8, %v618_v26, %v622_v30  ;;  %v626_v23 = vsel %vm56_vm8, %v622_v30, %v618_v26 }
 0x62e   :  { %v629_v35 = vmul.f32 %v963_v33, %v624_v31  ;;  %v630_v36 = vmul.f32 %v966_v34, %v626_v23 }
 0x630   :  { %v835_v37 = vpack.c.bf16 %v629_v35, %v627_v24  ;;  %v833_v38 = vpack.c.bf16 %v630_v36, %v628_v32 }
 0x632   :  { %834 = vmatprep.subr.bf16.mxu1 %v833_v38 }
 0x633   :  { %836 = vmatpush1.bf16.msra.mxu1 %v835_v37 }
 0x634   :  { %764 = vmatprep.subr.msk.mxu1 %vm116_vm10, %v874_v44 }
 0x637   :  { %765 = vmatpush1.msk.msra.mxu1 %vm116_vm10, %v874_v44 }
 0x638   :  { %766 = vmatmul.mubr.msk.f32.vlgmr.msra.gmra.mrb[2].mxu1 %vm312_vm2, %v566_v4 }
 0x70b   :  { %v700_v39 = vpop.f32.mrb[2].mxu1 }
 0x70c   :  { %v767_v33 = vmul.f32 -1.442695, %v700_v39  ;;  %v702_v40 = vpop.f32.mrb[3].mxu1  ;;  %v717_v47 = vmax.f32 %v700_v39, -10.0 }
 0x70d   :  { %v768_v34 = vmul.f32 -1.442695, %v702_v40  ;;  %v718_v48 = vmax.f32 %v702_v40, -10.0 }
 0x70e   :  { %856 = vpow2.f32 %v767_v33  ;;  %v719_v49 = vmin.f32 %v717_v47, 0.0 }
 0x70f   :  { %858 = vpow2.f32 %v768_v34  ;;  %v720_v51 = vmin.f32 %v718_v48, 0.0 }
 0x718   :  { %v857_v41 = vpop.eup %856 }
 0x719   :  { %v859_v42 = vpop.eup %858  ;;  %v711_v45 = vadd.f32 1.0, %v857_v41 }
 0x71a   :  { %v712_v46 = vadd.f32 1.0, %v859_v42 }
 0x71b   :  { %860 = vrcp.f32 %v711_v45 }
 0x71c   :  { %862 = vrcp.f32 %v712_v46 }
 0x725   :  { %v861_v50 = vpop.eup %860 }
 0x726   :  { %v863_v44 = vpop.eup %862  ;;  %v721_v43 = vsel %vm64_vm3, %v861_v50, %v719_v49  ;;  %v725_v62 = vsel %vm64_vm3, %v861_v50, 0.0 }
 0x727   :  { %v723_v52 = vrot.slane %v721_v43, 4  ;;  %737 = vst [vmem:[%s1264_s2 + $0x10] sm:$0xff] %v721_v43  ;;  %v722_v53 = vsel %vm64_vm3, %v863_v44, %v720_v51  ;;  %v726_v2 = vsel %vm64_vm3, %v863_v44, 0.0 }
 0x728   :  { %v724_v54 = vrot.slane %v722_v53, 4  ;;  %738 = vst [vmem:[%s1264_s2 + $0x18] sm:$0xff] %v722_v53 }
 0x729   :  { %v727_v55 = vmul.f32 1.442695, %v723_v52 }
 0x72a   :  { %v729_v56 = vmul.f32 1.442695, %v724_v54 }
 0x72b   :  { %864 = vpow2.f32 %v727_v55 }
 0x72c   :  { %866 = vpow2.f32 %v729_v56 }
 0x735   :  { %v865_v59 = vpop.eup %864 }
 0x736   :  { %v867_v60 = vpop.eup %866  ;;  %v731_v61 = vmul.f32 %v865_v59, %v69_v57 }
 0x737   :  { %v732_v63 = vmul.f32 %v867_v60, %v70_v1 }
 0x738   :  { %v733_v0 = vadd.f32 %v731_v61, %v725_v62 }
 0x739   :  { %v734_v10 = vadd.f32 %v732_v63, %v726_v2 }
 0x73a   :  { %735 = vst [vmem:[%s1264_s2] sm:$0xff] %v733_v0 }
 0x73b   :  { %736 = vst [vmem:[%s1264_s2 + $0x8] sm:$0xff] %v734_v10 }

</bundles_post_ra>
